<compile_context>
chip_gen: v5e
topology: v5e:2x2
jax: 0.10.0
libtpu: 0.0.40
codegen_flags: <defaults>
</compile_context>

<pallas_src>
import functools

import jax
import jax.numpy as jnp
from jax.experimental import pallas as pl
from jax.experimental.pallas import tpu as pltpu


def _loss_kernel(pred_ref, target_ref, trans_ref, out_ref, nll_acc, mat_acc, *,
                 total_b, block_b, steps_per_core, mat_scale):
    j = pl.program_id(1)                       # reduction ("arbitrary") axis

    @pl.when(j == 0)
    def _():
        nll_acc[...] = jnp.zeros_like(nll_acc)
        mat_acc[...] = jnp.zeros_like(mat_acc)

    pred = pred_ref[...]                       # (Bb, C)  f32 log-probs
    target = target_ref[...]                   # (Bb, 1)  int32
    trans = trans_ref[...]                     # (Bb, D, D) f32 or bf16

    bb, c_dim = pred.shape

    # Global row mask: handles the padded trailing block and any redundant
    # (clamped) step when num_blocks is not divisible by num_cores.
    g = pl.program_id(0) * steps_per_core + j                  # logical block idx
    row = jax.lax.broadcasted_iota(jnp.int32, (bb, 1), 0) + g * block_b
    valid = row < total_b                                      # (Bb, 1) bool

    # ---- NLL partial sum: sum_b pred[b, target[b]] over valid rows ----
    col = jax.lax.broadcasted_iota(jnp.int32, (bb, c_dim), 1)
    picked = jnp.sum(jnp.where(col == target, pred, 0.0), axis=-1, keepdims=True)
    nll_acc[...] += jnp.sum(jnp.where(valid, picked, 0.0), keepdims=True)

    # ---- regularizer partial sum: || A (A^T - I) ||_F = || A A^T - A ||_F ----
    ttT = jnp.einsum("bij,bkj->bik", trans, trans,
                     preferred_element_type=jnp.float32)       # (Bb, D, D) f32
    m = ttT - trans.astype(jnp.float32)
    sq = jnp.sum(m * m, axis=-1)                               # (Bb, D)
    fro = jnp.sqrt(jnp.sum(sq, axis=-1, keepdims=True))        # (Bb, 1)
    mat_acc[...] += jnp.sum(jnp.where(valid, fro, 0.0), keepdims=True)

    # ---- epilogue: only on this core's last step ----
    @pl.when(j == pl.num_programs(1) - 1)
    def _():
        inv_b = 1.0 / total_b                                  # Python constant
        total = (mat_scale * mat_acc[...] - nll_acc[...]) * inv_b   # (1, 1)
        out_ref[...] = total.reshape(1, 1, 1)


def get_loss_pallas(pred, target, trans_feat, mat_diff_loss_scale=0.001, *,
                    block_b=128, num_cores=1, trans_dtype=None,
                    trans_buffers=2, vmem_limit_bytes=None):
    """pred: (B, C) f32 log-probs; target: (B,) int; trans_feat: (B, D, D) f32.

    block_b:      batch rows per grid step (<=256 recommended on v7x,
                  512..1024 on v5e/v6e).
    num_cores:    explicit core split on the leading ("parallel") grid axis
                  (use 2 on v7x; safe anywhere).
    trans_dtype:  e.g. jnp.bfloat16 to halve HBM traffic of the dominant input.
    trans_buffers: pipeline depth for the trans stream (>2 only if profiling
                  shows exposed DMA, e.g. on v5e).
    """
    B, C = pred.shape
    D = trans_feat.shape[-1]

    if pred.dtype != jnp.float32:
        pred = pred.astype(jnp.float32)
    if trans_dtype is not None:
        if trans_feat.dtype != trans_dtype:
            trans_feat = trans_feat.astype(trans_dtype)
    elif trans_feat.dtype != jnp.float32:
        trans_feat = trans_feat.astype(jnp.float32)
    target2d = target.astype(jnp.int32).reshape(B, 1)

    # Batch block: full array if small, otherwise a multiple of 8 (sublane rule).
    block_b = int(min(block_b, B))
    if block_b < B and block_b % 8 != 0:
        block_b = min(B, ((block_b + 7) // 8) * 8)

    num_blocks = pl.cdiv(B, block_b)
    num_cores = max(1, min(int(num_cores), num_blocks))
    steps = pl.cdiv(num_blocks, num_cores)

    def blk_idx(c, j):
        # Clamp so redundant steps (when num_blocks % num_cores != 0) stay in
        # bounds; their contribution is masked out inside the kernel.
        return jnp.minimum(c * steps + j, num_blocks - 1)

    trans_spec_kwargs = {}
    if trans_buffers and trans_buffers != 2:
        trans_spec_kwargs["pipeline_mode"] = pl.Buffered(int(trans_buffers))
    trans_spec = pl.BlockSpec((block_b, D, D),
                              lambda c, j: (blk_idx(c, j), 0, 0),
                              **trans_spec_kwargs)

    kernel = functools.partial(
        _loss_kernel,
        total_b=B, block_b=block_b, steps_per_core=steps,
        mat_scale=float(mat_diff_loss_scale),
    )

    partials = pl.pallas_call(
        kernel,
        out_shape=jax.ShapeDtypeStruct((num_cores, 1, 1), jnp.float32),
        grid_spec=pltpu.PrefetchScalarGridSpec(
            num_scalar_prefetch=0,
            grid=(num_cores, steps),
            in_specs=[
                pl.BlockSpec((block_b, C), lambda c, j: (blk_idx(c, j), 0)),
                pl.BlockSpec((block_b, 1), lambda c, j: (blk_idx(c, j), 0)),
                trans_spec,
            ],
            out_specs=pl.BlockSpec((1, 1, 1), lambda c, j: (c, 0, 0)),
            scratch_shapes=[pltpu.VMEM((1, 1), jnp.float32),   # nll accumulator
                            pltpu.VMEM((1, 1), jnp.float32)],  # mat accumulator
        ),
        compiler_params=pltpu.CompilerParams(
            dimension_semantics=("parallel", "arbitrary"),
            vmem_limit_bytes=vmem_limit_bytes),
    )(pred, target2d, trans_feat)

    return jnp.sum(partials)   # sum per-core partial losses -> scalar


def _ref_loss(pred, target, trans, scale=0.001):
    """Pure-JAX reference matching the PyTorch module:
    bmm(A, A^T - I) == A A^T - A, per-batch Frobenius norm, mean."""
    b = pred.shape[0]
    nll = -jnp.mean(pred[jnp.arange(b), target])
    ttT = jnp.einsum("bij,bkj->bik", trans, trans)
    m = ttT - trans
    mat = jnp.mean(jnp.sqrt(jnp.sum(m * m, axis=(1, 2))))
    return nll + scale * mat


if __name__ == "__main__":
    key = jax.random.PRNGKey(0)
    k1, k2, k3 = jax.random.split(key, 3)

    B, C, D = 2, 16, 64  # small shapes consistent with PointNet cls loss

    logits = jax.random.normal(k1, (B, C), dtype=jnp.float32)
    pred = jax.nn.log_softmax(logits, axis=-1)           # log-probs, as NLL expects
    target = jax.random.randint(k2, (B,), 0, C, dtype=jnp.int32)
    trans_feat = jax.random.normal(k3, (B, D, D), dtype=jnp.float32)

    # 1) default f32 path (tiny batch -> single block, grid (1, 1))
    out1 = jax.block_until_ready(get_loss_pallas(pred, target, trans_feat))
    ref1 = _ref_loss(pred, target, trans_feat)
    assert jnp.allclose(out1, ref1, rtol=1e-4, atol=1e-4), (out1, ref1)

    # 2) tiled batch with a masked tail + explicit 2-way core split
    #    (exercises the accumulator / "parallel","arbitrary" grid; safe on 1-TC chips)
    B2 = 10
    kk1, kk2, kk3 = jax.random.split(jax.random.PRNGKey(1), 3)
    pred2 = jax.nn.log_softmax(jax.random.normal(kk1, (B2, C), dtype=jnp.float32), axis=-1)
    target2 = jax.random.randint(kk2, (B2,), 0, C, dtype=jnp.int32)
    trans2 = jax.random.normal(kk3, (B2, D, D), dtype=jnp.float32)
    out2 = jax.block_until_ready(
        get_loss_pallas(pred2, target2, trans2, block_b=8, num_cores=2))
    ref2 = _ref_loss(pred2, target2, trans2)
    assert jnp.allclose(out2, ref2, rtol=1e-4, atol=1e-4), (out2, ref2)

    # 3) bf16 trans stream (halves dominant HBM traffic); looser tolerance vs f32 ref
    out3 = jax.block_until_ready(
        get_loss_pallas(pred2, target2, trans2, block_b=8, trans_dtype=jnp.bfloat16))
    assert jnp.allclose(out3, ref2, rtol=1e-2, atol=1e-2), (out3, ref2)

    print("KERNEL_OK")
</pallas_src>

<mosaic_0001>
module attributes {stable_mosaic.version = 11 : i64} {
  func.func @_loss_kernel(%arg0: i32, %arg1: i32, %arg2: memref<2x16xf32, #tpu.memory_space<vmem>>, %arg3: memref<2x1xi32, #tpu.memory_space<vmem>>, %arg4: memref<2x64x64xf32, #tpu.memory_space<vmem>>, %arg5: memref<1x1x1xf32, #tpu.memory_space<vmem>>, %arg6: memref<1x1xf32, #tpu.memory_space<vmem>>, %arg7: memref<1x1xf32, #tpu.memory_space<vmem>>) attributes {dimension_semantics = [#tpu.dimension_semantics<parallel>, #tpu.dimension_semantics<arbitrary>], iteration_bounds = array<i64: 1, 1>, scalar_prefetch = 0 : i64, scratch_operands = 2 : i64, tpu.core_type = #tpu.core_type<tc>, window_params = [{transform_indices = @transform_0, window_bounds = array<i64: 2, 16>}, {transform_indices = @transform_1, window_bounds = array<i64: 2, 1>}, {transform_indices = @transform_2, window_bounds = array<i64: 2, 64, 64>}, {transform_indices = @transform_3, window_bounds = array<i64: 1, 1, 1>}]} {
    %c0_i32 = arith.constant 0 : i32
    %0 = arith.cmpi eq, %arg1, %c0_i32 : i32
    %1 = arith.extui %0 : i1 to i32
    %c0_i32_0 = arith.constant 0 : i32
    %2 = arith.cmpi ne, %1, %c0_i32_0 : i32
    scf.if %2 {
      %cst_26 = arith.constant 0.000000e+00 : f32
      %51 = vector.broadcast %cst_26 : f32 to vector<1x1xf32>
      %c0_27 = arith.constant 0 : index
      %c0_28 = arith.constant 0 : index
      %52 = vector.load %arg6[%c0_27, %c0_28] : memref<1x1xf32, #tpu.memory_space<vmem>>, vector<1x1xf32>
      tpu.vector_store %arg6[%c0_27, %c0_28], %51 {strides = array<i32>} : memref<1x1xf32, #tpu.memory_space<vmem>>, vector<1x1xf32>,
      %cst_29 = arith.constant 0.000000e+00 : f32
      %53 = vector.broadcast %cst_29 : f32 to vector<1x1xf32>
      %c0_30 = arith.constant 0 : index
      %c0_31 = arith.constant 0 : index
      %54 = vector.load %arg7[%c0_30, %c0_31] : memref<1x1xf32, #tpu.memory_space<vmem>>, vector<1x1xf32>
      tpu.vector_store %arg7[%c0_30, %c0_31], %53 {strides = array<i32>} : memref<1x1xf32, #tpu.memory_space<vmem>>, vector<1x1xf32>,
    } else {
    }
    %c0 = arith.constant 0 : index
    %c0_1 = arith.constant 0 : index
    %3 = vector.load %arg2[%c0, %c0_1] : memref<2x16xf32, #tpu.memory_space<vmem>>, vector<2x16xf32>
    %c0_2 = arith.constant 0 : index
    %c0_3 = arith.constant 0 : index
    %4 = vector.load %arg3[%c0_2, %c0_3] : memref<2x1xi32, #tpu.memory_space<vmem>>, vector<2x1xi32>
    %c0_4 = arith.constant 0 : index
    %c0_5 = arith.constant 0 : index
    %c0_6 = arith.constant 0 : index
    %5 = vector.load %arg4[%c0_4, %c0_5, %c0_6] : memref<2x64x64xf32, #tpu.memory_space<vmem>>, vector<2x64x64xf32>
    %c1_i32 = arith.constant 1 : i32
    %6 = arith.muli %arg0, %c1_i32 : i32
    %7 = arith.addi %6, %arg1 : i32
    %8 = tpu.iota {dimensions = array<i32: 0>} : vector<2x1xi32>
    %c2_i32 = arith.constant 2 : i32
    %9 = arith.muli %7, %c2_i32 : i32
    %10 = vector.broadcast %9 : i32 to vector<2x1xi32>
    %11 = arith.addi %8, %10 : vector<2x1xi32>
    %c2_i32_7 = arith.constant 2 : i32
    %12 = vector.broadcast %c2_i32_7 : i32 to vector<2x1xi32>
    %13 = arith.cmpi slt, %11, %12 : vector<2x1xi32>
    %14 = tpu.iota {dimensions = array<i32: 1>} : vector<2x16xi32>
    %15 = vector.broadcast %4 : vector<2x1xi32> to vector<2x16xi32>
    %16 = arith.cmpi eq, %14, %15 : vector<2x16xi32>
    %cst = arith.constant 0.000000e+00 : f32
    %17 = vector.broadcast %cst : f32 to vector<2x16xf32>
    %18 = arith.select %16, %3, %17 : vector<2x16xi1>, vector<2x16xf32>
    %cst_8 = arith.constant dense<0.000000e+00> : vector<2xf32>
    %19 = vector.multi_reduction <add>, %18, %cst_8 [1] : vector<2x16xf32> to vector<2xf32>
    %20 = vector.shape_cast %19 : vector<2xf32> to vector<2x1xf32>
    %c0_9 = arith.constant 0 : index
    %c0_10 = arith.constant 0 : index
    %21 = vector.load %arg6[%c0_9, %c0_10] : memref<1x1xf32, #tpu.memory_space<vmem>>, vector<1x1xf32>
    %cst_11 = arith.constant 0.000000e+00 : f32
    %22 = vector.broadcast %cst_11 : f32 to vector<2x1xf32>
    %23 = arith.select %13, %20, %22 : vector<2x1xi1>, vector<2x1xf32>
    %24 = vector.shape_cast %23 : vector<2x1xf32> to vector<1x2x1xf32>
    %cst_12 = arith.constant dense<0.000000e+00> : vector<1xf32>
    %25 = vector.multi_reduction <add>, %24, %cst_12 [1, 2] : vector<1x2x1xf32> to vector<1xf32>
    %26 = vector.shape_cast %25 : vector<1xf32> to vector<1x1x1xf32>
    %27 = vector.extract %26[0, 0, 0] : f32 from vector<1x1x1xf32>
    %28 = vector.broadcast %27 : f32 to vector<1x1xf32>
    %29 = arith.addf %21, %28 : vector<1x1xf32>
    %c0_13 = arith.constant 0 : index
    %c0_14 = arith.constant 0 : index
    %30 = vector.load %arg6[%c0_13, %c0_14] : memref<1x1xf32, #tpu.memory_space<vmem>>, vector<1x1xf32>
    tpu.vector_store %arg6[%c0_13, %c0_14], %29 {strides = array<i32>} : memref<1x1xf32, #tpu.memory_space<vmem>>, vector<1x1xf32>,
    "tpu.trace_start"() <{level = 10 : i32, message = "bij,bkj->bik"}> : () -> ()
    %cst_15 = arith.constant dense<0.000000e+00> : vector<2x64x64xf32>
    %31 = tpu.matmul %5, %5, %cst_15 {dimension_numbers = #tpu.dot_dimension_numbers<[2], [2], [1], [1], [0, 0, 0, 1, 1, 1], [0], [0]>} : vector<2x64x64xf32>, vector<2x64x64xf32>, vector<2x64x64xf32> -> vector<2x64x64xf32>
    "tpu.trace_stop"() : () -> ()
    %32 = arith.subf %31, %5 : vector<2x64x64xf32>
    %33 = arith.mulf %32, %32 : vector<2x64x64xf32>
    %cst_16 = arith.constant dense<0.000000e+00> : vector<2x64xf32>
    %34 = vector.multi_reduction <add>, %33, %cst_16 [2] : vector<2x64x64xf32> to vector<2x64xf32>
    %cst_17 = arith.constant dense<0.000000e+00> : vector<2xf32>
    %35 = vector.multi_reduction <add>, %34, %cst_17 [1] : vector<2x64xf32> to vector<2xf32>
    %36 = vector.shape_cast %35 : vector<2xf32> to vector<2x1xf32>
    %37 = math.sqrt %36 : vector<2x1xf32>
    %c0_18 = arith.constant 0 : index
    %c0_19 = arith.constant 0 : index
    %38 = vector.load %arg7[%c0_18, %c0_19] : memref<1x1xf32, #tpu.memory_space<vmem>>, vector<1x1xf32>
    %cst_20 = arith.constant 0.000000e+00 : f32
    %39 = vector.broadcast %cst_20 : f32 to vector<2x1xf32>
    %40 = arith.select %13, %37, %39 : vector<2x1xi1>, vector<2x1xf32>
    %41 = vector.shape_cast %40 : vector<2x1xf32> to vector<1x2x1xf32>
    %cst_21 = arith.constant dense<0.000000e+00> : vector<1xf32>
    %42 = vector.multi_reduction <add>, %41, %cst_21 [1, 2] : vector<1x2x1xf32> to vector<1xf32>
    %43 = vector.shape_cast %42 : vector<1xf32> to vector<1x1x1xf32>
    %44 = vector.extract %43[0, 0, 0] : f32 from vector<1x1x1xf32>
    %45 = vector.broadcast %44 : f32 to vector<1x1xf32>
    %46 = arith.addf %38, %45 : vector<1x1xf32>
    %c0_22 = arith.constant 0 : index
    %c0_23 = arith.constant 0 : index
    %47 = vector.load %arg7[%c0_22, %c0_23] : memref<1x1xf32, #tpu.memory_space<vmem>>, vector<1x1xf32>
    tpu.vector_store %arg7[%c0_22, %c0_23], %46 {strides = array<i32>} : memref<1x1xf32, #tpu.memory_space<vmem>>, vector<1x1xf32>,
    %c0_i32_24 = arith.constant 0 : i32
    %48 = arith.cmpi eq, %arg1, %c0_i32_24 : i32
    %49 = arith.extui %48 : i1 to i32
    %c0_i32_25 = arith.constant 0 : i32
    %50 = arith.cmpi ne, %49, %c0_i32_25 : i32
    scf.if %50 {
      %c0_26 = arith.constant 0 : index
      %c0_27 = arith.constant 0 : index
      %51 = vector.load %arg7[%c0_26, %c0_27] : memref<1x1xf32, #tpu.memory_space<vmem>>, vector<1x1xf32>
      %cst_28 = arith.constant 1.000000e-03 : f32
      %52 = vector.broadcast %cst_28 : f32 to vector<1x1xf32>
      %53 = arith.mulf %52, %51 : vector<1x1xf32>
      %c0_29 = arith.constant 0 : index
      %c0_30 = arith.constant 0 : index
      %54 = vector.load %arg6[%c0_29, %c0_30] : memref<1x1xf32, #tpu.memory_space<vmem>>, vector<1x1xf32>
      %55 = arith.subf %53, %54 : vector<1x1xf32>
      %cst_31 = arith.constant 5.000000e-01 : f32
      %56 = vector.broadcast %cst_31 : f32 to vector<1x1xf32>
      %57 = arith.mulf %55, %56 : vector<1x1xf32>
      %58 = vector.shape_cast %57 : vector<1x1xf32> to vector<1x1x1xf32>
      %c0_32 = arith.constant 0 : index
      %c0_33 = arith.constant 0 : index
      %c0_34 = arith.constant 0 : index
      %59 = vector.load %arg5[%c0_32, %c0_33, %c0_34] : memref<1x1x1xf32, #tpu.memory_space<vmem>>, vector<1x1x1xf32>
      tpu.vector_store %arg5[%c0_32, %c0_33, %c0_34], %58 {strides = array<i32>} : memref<1x1x1xf32, #tpu.memory_space<vmem>>, vector<1x1x1xf32>,
    } else {
    }
    return
  }
  func.func @transform_0(%arg0: i32, %arg1: i32) -> (i32, i32) {
    %c1_i32 = arith.constant 1 : i32
    %0 = arith.muli %arg0, %c1_i32 : i32
    %1 = arith.addi %0, %arg1 : i32
    %c0_i32 = arith.constant 0 : i32
    %2 = arith.minsi %1, %c0_i32 : i32
    %c0_i32_0 = arith.constant 0 : i32
    %c0_i32_1 = arith.constant 0 : i32
    return %2, %c0_i32_0 : i32, i32
  }
  func.func @transform_1(%arg0: i32, %arg1: i32) -> (i32, i32) {
    %c1_i32 = arith.constant 1 : i32
    %0 = arith.muli %arg0, %c1_i32 : i32
    %1 = arith.addi %0, %arg1 : i32
    %c0_i32 = arith.constant 0 : i32
    %2 = arith.minsi %1, %c0_i32 : i32
    %c0_i32_0 = arith.constant 0 : i32
    %c0_i32_1 = arith.constant 0 : i32
    return %2, %c0_i32_0 : i32, i32
  }
  func.func @transform_2(%arg0: i32, %arg1: i32) -> (i32, i32, i32) {
    %c1_i32 = arith.constant 1 : i32
    %0 = arith.muli %arg0, %c1_i32 : i32
    %1 = arith.addi %0, %arg1 : i32
    %c0_i32 = arith.constant 0 : i32
    %2 = arith.minsi %1, %c0_i32 : i32
    %c0_i32_0 = arith.constant 0 : i32
    %c0_i32_1 = arith.constant 0 : i32
    %c0_i32_2 = arith.constant 0 : i32
    return %2, %c0_i32_0, %c0_i32_1 : i32, i32, i32
  }
  func.func @transform_3(%arg0: i32, %arg1: i32) -> (i32, i32, i32) {
    %c0_i32 = arith.constant 0 : i32
    %c0_i32_0 = arith.constant 0 : i32
    %c0_i32_1 = arith.constant 0 : i32
    return %arg0, %c0_i32, %c0_i32_0 : i32, i32, i32
  }
}

</mosaic_0001>

<bundles_post_ra>
// kernel: tpu_custom_call.1
= control target key start
LH: loop header
LB: loop body
LE: loop exit
PB: predicated region body
PF: predicated region fallthrough
CT: control target
= control target key end

     0   :  { %8 = vsyncpa [#allocation5], 0  ;;  %s798_s0 = inlined_call_operand.vmem [shape: f32[2,16], index: 0, kind: input, shape index: {}]   ;;  %s799_s1 = inlined_call_operand.vmem [shape: s32[2,1], index: 1, kind: input, shape index: {}]   ;;  %s800_s2 = inlined_call_operand.hbm [shape: f32[2,64,64], index: 2, kind: input, shape index: {}]   ;;  %s801_s3 = inlined_call_operand.hbm [shape: f32[1,1,1], index: 3, kind: output, shape index: {}]  }
   0x1   :  { %9 = vsyncpa [#allocation6], 0  ;;  %s45_s14 = sshll.u32 %s800_s2, 4  ;;  %s615_s15 = smov [#allocation4]   ;;  %s46_s14 = int_to_ptr.hbm [resolvable:$true] %s45_s14 }
   0x2   :  { %s47_s16 = sshll.u32 %s615_s15, 4  ;;  %s616_s17 = smov 128   ;;  %s48_s16 = int_to_ptr.vmem [resolvable:$true] %s47_s16 }
   0x3   :  { %s617_s18 = smov 8  }
   0x4   :  { %53 = dma.hbm_to_vmem [thread:$0]  %s46_s14, 2048, %s48_s16, [#allocation5], %s616_s17, %s616_s17, %s617_s18  }
   0x5   :  { %611 = dma.done.wait [#allocation5], 2048  }
   0x6   :  { %612 = vsyncadd [#allocation5], 4294965248  ;;  %vm156_vm0 = vcmask 523264   ;;  %v644_v0 = vld [vmem:[#allocation4 + $0x38] sm:$0xff]  ;;  %v656_v2 = vld [vmem:[#allocation4 + $0x30] sm:$0xff]  ;;  %v618_v42 = vmov 0  }
   0x7   :  { %v646_v1 = vld [vmem:[#allocation4 + $0x78] sm:$0xff]  ;;  %501 = vmatpush.xpose.msk.msra.mxu0 %vm156_vm0, %v644_v0  ;;  %533 = vmatpush.xpose.msk.msra.mxu2 %vm156_vm0, %v644_v0  ;;  %v658_v3 = vld [vmem:[#allocation4 + $0x70] sm:$0xff]  ;;  %v668_v4 = vld [vmem:[#allocation4 + $0x28] sm:$0xff]  ;;  %vm386_vm1 = vcmask 130112   ;;  %vm390_vm2 = vcmask 195712   ;;  %vm394_vm3 = vcmask 261312  }
   0x8   :  { %517 = vmatpush.xpose.msk.msra.mxu1 %vm156_vm0, %v646_v1  ;;  %541 = vmatpush.xpose.msk.msra.mxu3 %vm156_vm0, %v646_v1  ;;  %v670_v5 = vld [vmem:[#allocation4 + $0x68] sm:$0xff]  ;;  %v109_v6 = vld [vmem:[#allocation4 + $0x20] sm:$0xff]  ;;  %v684_v8 = vld [vmem:[#allocation4 + $0x18] sm:$0xff]  ;;  %vm398_vm4 = vcmask 326912   ;;  %vm402_vm5 = vcmask 392512   ;;  %vm406_vm6 = vcmask 458112  }
   0x9   :  { %v117_v7 = vld [vmem:[#allocation4 + $0x60] sm:$0xff]  ;;  %v686_v9 = vld [vmem:[#allocation4 + $0x58] sm:$0xff]  ;;  %v696_v10 = vld [vmem:[#allocation4 + $0x10] sm:$0xff]  ;;  %560 = vset.pattern.permute.xlu0 %v618_v42  ;;  %559 = vset.pattern.permute.xlu1 %v618_v42  ;;  %vm410_vm7 = vcmask 523712   ;;  %vm427_vm8 = vcmask 1041409   ;;  %vm430_vm9 = vcmask 517120  }
   0xa   :  { %v698_v11 = vld [vmem:[#allocation4 + $0x50] sm:$0xff]  ;;  %v106_v12 = vld [vmem:[#allocation4 + $0x8] sm:$0xff]  ;;  %v105_v14 = vld [vmem:[#allocation4] sm:$0xff]  ;;  %vm135_vm10 = vcmask 123904   ;;  %vm141_vm13 = vcmask 1024   ;;  %s620_s22 = smov [#allocation7]  }
   0xb   :  { %502 = vmatpush.xpose.msk.msra.mxu0 %vm156_vm0, %v656_v2  ;;  %534 = vmatpush.xpose.msk.msra.mxu2 %vm156_vm0, %v656_v2  ;;  %v114_v13 = vld [vmem:[#allocation4 + $0x48] sm:$0xff]  ;;  %v113_v15 = vld [vmem:[#allocation4 + $0x40] sm:$0xff]  ;;  %s475_s23 = sshll.u32 %s620_s22, 4  ;;  %s477_s26 = sshll.u32 %s801_s3, 4  ;;  %s476_s23 = int_to_ptr.vmem [resolvable:$true] %s475_s23  ;;  %s478_s26 = int_to_ptr.hbm [resolvable:$true] %s477_s26 }
   0xc   :  { %518 = vmatpush.xpose.msk.msra.mxu1 %vm156_vm0, %v658_v3  ;;  %542 = vmatpush.xpose.msk.msra.mxu3 %vm156_vm0, %v658_v3 }
   0xf   :  { %503 = vmatpush.xpose.msk.msra.mxu0 %vm156_vm0, %v668_v4  ;;  %535 = vmatpush.xpose.msk.msra.mxu2 %vm156_vm0, %v668_v4 }
  0x10   :  { %519 = vmatpush.xpose.msk.msra.mxu1 %vm156_vm0, %v670_v5  ;;  %543 = vmatpush.xpose.msk.msra.mxu3 %vm156_vm0, %v670_v5 }
  0x13   :  { %504 = vmatpush.xpose.msk.msra.mxu0 %vm156_vm0, %v109_v6  ;;  %536 = vmatpush.xpose.msk.msra.mxu2 %vm156_vm0, %v109_v6 }
  0x14   :  { %520 = vmatpush.xpose.msk.msra.mxu1 %vm156_vm0, %v117_v7  ;;  %544 = vmatpush.xpose.msk.msra.mxu3 %vm156_vm0, %v117_v7 }
  0x17   :  { %505 = vmatpush.xpose.msk.msra.mxu0 %vm156_vm0, %v684_v8  ;;  %537 = vmatpush.xpose.msk.msra.mxu2 %vm156_vm0, %v684_v8 }
  0x18   :  { %521 = vmatpush.xpose.msk.msra.mxu1 %vm156_vm0, %v686_v9  ;;  %545 = vmatpush.xpose.msk.msra.mxu3 %vm156_vm0, %v686_v9 }
  0x1b   :  { %506 = vmatpush.xpose.msk.msra.mxu0 %vm156_vm0, %v696_v10  ;;  %538 = vmatpush.xpose.msk.msra.mxu2 %vm156_vm0, %v696_v10 }
  0x1c   :  { %522 = vmatpush.xpose.msk.msra.mxu1 %vm156_vm0, %v698_v11  ;;  %546 = vmatpush.xpose.msk.msra.mxu3 %vm156_vm0, %v698_v11 }
  0x1f   :  { %507 = vmatpush.xpose.msk.msra.mxu0 %vm156_vm0, %v106_v12  ;;  %539 = vmatpush.xpose.msk.msra.mxu2 %vm156_vm0, %v106_v12 }
  0x20   :  { %523 = vmatpush.xpose.msk.msra.mxu1 %vm156_vm0, %v114_v13  ;;  %547 = vmatpush.xpose.msk.msra.mxu3 %vm156_vm0, %v114_v13 }
  0x23   :  { %508 = vmatpush.xpose.msk.msra.mxu0 %vm156_vm0, %v105_v14  ;;  %540 = vmatpush.xpose.msk.msra.mxu2 %vm156_vm0, %v105_v14 }
  0x24   :  { %524 = vmatpush.xpose.msk.msra.mxu1 %vm156_vm0, %v113_v15  ;;  %548 = vmatpush.xpose.msk.msra.mxu3 %vm156_vm0, %v113_v15 }
  0x26   :  { %509 = vmatmul.msk.f32.vlgmr.msra.gmra.mxu0 %vm156_vm0, %v105_v14  ;;  %513 = vmatmul.msk.f32.vlgmr.msra.gmra.mxu2 %vm156_vm0, %v109_v6 }
  0x27   :  { %525 = vmatmul.msk.f32.vlgmr.msra.gmra.mxu1 %vm156_vm0, %v113_v15  ;;  %529 = vmatmul.msk.f32.vlgmr.msra.gmra.mxu3 %vm156_vm0, %v117_v7 }
  0x2e   :  { %514 = vmatmul.msk.f32.gmra.mxu2 %vm156_vm0, %v668_v4  ;;  %510 = vmatmul.msk.f32.gmra.mxu0 %vm156_vm0, %v106_v12 }
  0x2f   :  { %526 = vmatmul.msk.f32.gmra.mxu1 %vm156_vm0, %v114_v13  ;;  %530 = vmatmul.msk.f32.gmra.mxu3 %vm156_vm0, %v670_v5 }
  0x36   :  { %515 = vmatmul.msk.f32.gmra.mxu2 %vm156_vm0, %v656_v2  ;;  %511 = vmatmul.msk.f32.gmra.mxu0 %vm156_vm0, %v696_v10 }
  0x37   :  { %531 = vmatmul.msk.f32.gmra.mxu3 %vm156_vm0, %v658_v3  ;;  %527 = vmatmul.msk.f32.gmra.mxu1 %vm156_vm0, %v698_v11 }
  0x3e   :  { %512 = vmatmul.msk.f32.gmra.mxu0 %vm156_vm0, %v684_v8  ;;  %516 = vmatmul.msk.f32.gmra.mxu2 %vm156_vm0, %v644_v0 }
  0x3f   :  { %528 = vmatmul.msk.f32.gmra.mxu1 %vm156_vm0, %v686_v9  ;;  %532 = vmatmul.msk.f32.gmra.mxu3 %vm156_vm0, %v646_v1 }
  0xa3   :  { %v198_v16 = vpop.f32.mrf.mxu0 }
  0xa4   :  { %v287_v17 = vsub.f32 %v198_v16, %v105_v14  ;;  %v263_v18 = vpop.f32.mrf.mxu1 }
  0xa5   :  { %v295_v19 = vsub.f32 %v263_v18, %v113_v15 }
  0xa6   :  { %v303_v20 = vmul.f32 %v287_v17, %v287_v17 }
  0xa7   :  { %v311_v21 = vmul.f32 %v295_v19, %v295_v19 }
  0xa8   :  { %v319_v22 = vsel %vm156_vm0, %v303_v20, 0.0 }
  0xa9   :  { %v343_v23 = vsel %vm156_vm0, %v311_v21, 0.0  ;;  %v210_v24 = vpop.f32.mrf.mxu2  ;;  %320 = vadd.xlane.f32.xlu0 %v319_v22 }
  0xaa   :  { %v275_v25 = vpop.f32.mrf.mxu3  ;;  %344 = vadd.xlane.f32.xlu1 %v343_v23  ;;  %v291_v26 = vsub.f32 %v210_v24, %v109_v6 }
  0xab   :  { %v299_v27 = vsub.f32 %v275_v25, %v117_v7  ;;  %v201_v28 = vpop.f32.mrf.mxu0 }
  0xac   :  { %v307_v29 = vmul.f32 %v291_v26, %v291_v26  ;;  %v266_v30 = vpop.f32.mrf.mxu1  ;;  %v288_v34 = vsub.f32 %v201_v28, %v106_v12  ;;  %v122_v26 = vlaneseq }
  0xad   :  { %v315_v31 = vmul.f32 %v299_v27, %v299_v27  ;;  %v296_v32 = vsub.f32 %v266_v30, %v114_v13 }
  0xae   :  { %v331_v33 = vsel %vm156_vm0, %v307_v29, 0.0  ;;  %v304_v40 = vmul.f32 %v288_v34, %v288_v34  ;;  %v772_v27 = vand.u32 127, %v122_v26 }
  0xaf   :  { %v312_v35 = vmul.f32 %v296_v32, %v296_v32  ;;  %332 = vadd.xlane.f32.xlu2 %v331_v33  ;;  %v355_v36 = vsel %vm156_vm0, %v315_v31, 0.0 }
  0xb0   :  { %v322_v49 = vsel %vm156_vm0, %v304_v40, 0.0  ;;  %v384_v30 = vadd.s32 4294967288, %v772_v27  ;;  %v388_v32 = vadd.s32 4294967280, %v772_v27 }
  0xb1   :  { %v346_v37 = vsel %vm156_vm0, %v312_v35, 0.0  ;;  %356 = vadd.xlane.f32.xlu0 %v355_v36  ;;  %v213_v38 = vpop.f32.mrf.mxu2  ;;  %v392_v35 = vadd.s32 4294967272, %v772_v27  ;;  %v396_v36 = vadd.s32 4294967264, %v772_v27 }
  0xb2   :  { %v278_v39 = vpop.f32.mrf.mxu3  ;;  %347 = vadd.xlane.f32.xlu1 %v346_v37  ;;  %v292_v41 = vsub.f32 %v213_v38, %v668_v4 }
  0xb3   :  { %v300_v43 = vsub.f32 %v278_v39, %v670_v5  ;;  %v204_v44 = vpop.f32.mrf.mxu0 }
  0xb4   :  { %v308_v45 = vmul.f32 %v292_v41, %v292_v41  ;;  %v269_v46 = vpop.f32.mrf.mxu1  ;;  %v289_v48 = vsub.f32 %v204_v44, %v696_v10  ;;  %v400_v41 = vadd.s32 4294967256, %v772_v27 }
  0xb5   :  { %v316_v47 = vmul.f32 %v300_v43, %v300_v43  ;;  %v297_v4 = vsub.f32 %v269_v46, %v698_v11 }
  0xb6   :  { %v334_v51 = vsel %vm156_vm0, %v308_v45, 0.0  ;;  %v305_v52 = vmul.f32 %v289_v48, %v289_v48 }
  0xb7   :  { %v358_v50 = vsel %vm156_vm0, %v316_v47, 0.0  ;;  %v313_v7 = vmul.f32 %v297_v4, %v297_v4 }
  0xb8   :  { %359 = vadd.xlane.f32.xlu2 %v358_v50  ;;  %v325_v61 = vsel %vm156_vm0, %v305_v52, 0.0 }
  0xb9   :  { %323 = vadd.xlane.f32.xlu0 %v322_v49  ;;  %v216_v53 = vpop.f32.mrf.mxu2  ;;  %v349_v11 = vsel %vm156_vm0, %v313_v7, 0.0 }
  0xba   :  { %335 = vadd.xlane.f32.xlu1 %v334_v51  ;;  %v293_v54 = vsub.f32 %v216_v53, %v656_v2  ;;  %v281_v55 = vpop.f32.mrf.mxu3  ;;  %v404_v53 = vadd.s32 4294967248, %v772_v27 }
  0xbb   :  { %v301_v56 = vsub.f32 %v281_v55, %v658_v3  ;;  %v207_v57 = vpop.f32.mrf.mxu0 }
  0xbc   :  { %v309_v58 = vmul.f32 %v293_v54, %v293_v54  ;;  %v272_v59 = vpop.f32.mrf.mxu1  ;;  %v290_v63 = vsub.f32 %v207_v57, %v684_v8  ;;  %v408_v57 = vadd.s32 4294967240, %v772_v27 }
  0xbd   :  { %v317_v60 = vmul.f32 %v301_v56, %v301_v56  ;;  %v298_v6 = vsub.f32 %v272_v59, %v686_v9 }
  0xbe   :  { %v337_v62 = vsel %vm156_vm0, %v309_v58, 0.0  ;;  %v306_v2 = vmul.f32 %v290_v63, %v290_v63 }
  0xbf   :  { %v361_v5 = vsel %vm156_vm0, %v317_v60, 0.0  ;;  %v314_v10 = vmul.f32 %v298_v6, %v298_v6 }
  0xc0   :  { %326 = vadd.xlane.f32.xlu2 %v325_v61  ;;  %v328_v14 = vsel %vm156_vm0, %v306_v2, 0.0 }
  0xc1   :  { %338 = vadd.xlane.f32.xlu0 %v337_v62  ;;  %v219_v3 = vpop.f32.mrf.mxu2  ;;  %v352_v15 = vsel %vm156_vm0, %v314_v10, 0.0 }
  0xc2   :  { %362 = vadd.xlane.f32.xlu1 %v361_v5  ;;  %v284_v12 = vpop.f32.mrf.mxu3  ;;  %v294_v13 = vsub.f32 %v219_v3, %v644_v0  ;;  %v104_v0 = vld [vmem:[%s799_s1] sm:$0x3] }
  0xc3   :  { %v302_v8 = vsub.f32 %v284_v12, %v646_v1 }
  0xc4   :  { %v310_v9 = vmul.f32 %v294_v13, %v294_v13 }
  0xc5   :  { %v318_v16 = vmul.f32 %v302_v8, %v302_v8 }
  0xc6   :  { %v340_v17 = vsel %vm156_vm0, %v310_v9, 0.0 }
  0xc7   :  { %v364_v18 = vsel %vm156_vm0, %v318_v16, 0.0  ;;  %vm100_vm0 = vcmask 0  }
  0xc8   :  { %350 = vadd.xlane.f32.xlu2 %v349_v11  ;;  %v103_v11 = vld [vmem:[%s798_s0] sm:$0x3] }
  0xc9   :  { %329 = vadd.xlane.f32.xlu0 %v328_v14 }
  0xca   :  { %353 = vadd.xlane.f32.xlu1 %v352_v15 }
  0xd0   :  { %341 = vadd.xlane.f32.xlu2 %v340_v17 }
  0xd1   :  { %365 = vadd.xlane.f32.xlu0 %v364_v18 }
  0xe3   :  { %131 = vperm.xlu1 %559, %v104_v0  }
 0x11c   :  { %v321_v1 = vpop.xlane.xlu0 %320 }
 0x11d   :  { %v345_v19 = vpop.xlane.xlu1 %344  ;;  %v383_v39 = vperm.slane %v321_v1, %v772_v27  ;;  %v123_v1 = vshrl.u32 %v122_v26, 7  ;;  %v619_v26 = vmov 0.0  }
 0x11e   :  { %v412_v38 = vperm.slane %v345_v19, %v772_v27  ;;  %101 = vst.msk [vmem:[#allocation2] sm:$0x1] %vm100_vm0, %v619_v26 }
 0x11f   :  { %vm127_vm12 = vcmp.lt.s32.totalorder %v123_v1, 2  ;;  %102 = vst.msk [vmem:[#allocation3] sm:$0x1] %vm100_vm0, %v619_v26 }
 0x122   :  { %v333_v20 = vpop.xlane.xlu2 %332 }
 0x123   :  { %v397_v48 = vperm.slane %v333_v20, %v396_v36 }
 0x124   :  { %v357_v21 = vpop.xlane.xlu0 %356 }
 0x125   :  { %v348_v22 = vpop.xlane.xlu1 %347  ;;  %v419_v52 = vperm.slane %v357_v21, %v396_v36 }
 0x126   :  { %v413_v33 = vperm.slane %v348_v22, %v384_v30 }
 0x128   :  { %v414_v44 = vsel %vm386_vm1, %v413_v33, %v412_v38 }
 0x12b   :  { %v360_v23 = vpop.xlane.xlu2 %359 }
 0x12c   :  { %v324_v24 = vpop.xlane.xlu0 %323  ;;  %v421_v58 = vperm.slane %v360_v23, %v400_v41 }
 0x12d   :  { %v336_v25 = vpop.xlane.xlu1 %335  ;;  %v385_v34 = vperm.slane %v324_v24, %v384_v30 }
 0x12e   :  { %v401_v59 = vperm.slane %v336_v25, %v400_v41 }
 0x12f   :  { %v387_v45 = vsel %vm386_vm1, %v385_v34, %v383_v39 }
 0x133   :  { %v327_v28 = vpop.xlane.xlu2 %326 }
 0x134   :  { %v339_v29 = vpop.xlane.xlu0 %338  ;;  %v389_v37 = vperm.slane %v327_v28, %v388_v32 }
 0x135   :  { %v363_v31 = vpop.xlane.xlu1 %362  ;;  %v405_v5 = vperm.slane %v339_v29, %v404_v53 }
 0x136   :  { %v391_v49 = vsel %vm390_vm2, %v389_v37, %v387_v45  ;;  %v423_v4 = vperm.slane %v363_v31, %v404_v53 }
 0x13b   :  { %v351_v40 = vpop.xlane.xlu2 %350 }
 0x13c   :  { %v415_v42 = vperm.slane %v351_v40, %v388_v32  ;;  %v330_v43 = vpop.xlane.xlu0 %329 }
 0x13d   :  { %v354_v46 = vpop.xlane.xlu1 %353  ;;  %v393_v47 = vperm.slane %v330_v43, %v392_v35 }
 0x13e   :  { %v416_v50 = vsel %vm390_vm2, %v415_v42, %v414_v44  ;;  %v417_v51 = vperm.slane %v354_v46, %v392_v35 }
 0x13f   :  { %v395_v54 = vsel %vm394_vm3, %v393_v47, %v391_v49  ;;  %v139_v47 = vld [vmem:[#allocation2] sm:$0x1] }
 0x140   :  { %v418_v55 = vsel %vm394_vm3, %v417_v51, %v416_v50  ;;  %v399_v56 = vsel %vm398_vm4, %v397_v48, %v395_v54  ;;  %v446_v50 = vld [vmem:[#allocation3] sm:$0x1] }
 0x141   :  { %v420_v60 = vsel %vm398_vm4, %v419_v52, %v418_v55  ;;  %v403_v62 = vsel %vm402_vm5, %v401_v59, %v399_v56 }
 0x142   :  { %v422_v63 = vsel %vm402_vm5, %v421_v58, %v420_v60  ;;  %v407_v7 = vsel %vm406_vm6, %v405_v5, %v403_v62 }
 0x143   :  { %v342_v61 = vpop.xlane.xlu2 %341  ;;  %v424_v10 = vsel %vm406_vm6, %v423_v4, %v422_v63 }
 0x144   :  { %v409_v6 = vperm.slane %v342_v61, %v408_v57  ;;  %v366_v2 = vpop.xlane.xlu0 %365 }
 0x145   :  { %v425_v3 = vperm.slane %v366_v2, %v408_v57 }
 0x146   :  { %v411_v12 = vsel %vm410_vm7, %v409_v6, %v407_v7 }
 0x147   :  { %v426_v13 = vsel %vm410_vm7, %v425_v3, %v424_v10 }
 0x148   :  { %v428_v14 = vsel %vm427_vm8, %v426_v13, %v411_v12 }
 0x149   :  { %v431_v8 = vsel %vm430_vm9, %v428_v14, 0.0 }
 0x14a   :  { %432 = vadd.xlane.f32.xlu2 %v431_v8 }
 0x155   :  { %v132_v15 = vpop.permute.xlu1 %131 }
 0x156   :  { %vm133_vm11 = vcmp.eq.s32.totalorder %v772_v27, %v132_v15 }
 0x157   :  { %v134_v9 = vsel %vm133_vm11, %v103_v11, 0.0 }
 0x158   :  { %v136_v16 = vsel %vm135_vm10, %v134_v9, 0.0 }
 0x159   :  { %137 = vadd.xlane.f32.xlu0 %v136_v16 }
 0x1bd   :  { %v433_v17 = vpop.xlane.xlu2 %432 }
 0x1be   :  { %561 = vrsqrt.f32 %v433_v17  ;;  %vm441_vm14 = vcmp.eq.f32.partialorder %v433_v17, inf  ;;  %v444_v28 = vand.u32 2147483648, %v433_v17  ;;  %vm443_vm15 = vcmp.eq.f32.partialorder %v433_v17, 0.0 }
 0x1c4   :  { %v562_v18 = vpop.eup %561 }
 0x1c5   :  { %v435_v0 = vmul.f32 %v562_v18, %v433_v17 }
 0x1c7   :  { %v436_v19 = vmul.f32 %v562_v18, %v435_v0 }
 0x1c9   :  { %v437_v20 = vmul.f32 0.5, %v436_v19 }
 0x1cb   :  { %v438_v21 = vsub.f32 1.5, %v437_v20 }
 0x1cc   :  { %v138_v22 = vpop.xlane.xlu0 %137 }
 0x1cd   :  { %v140_v23 = vsel %vm127_vm12, %v138_v22, 0.0  ;;  %v439_v24 = vmul.f32 %v562_v18, %v438_v21 }
 0x1ce   :  { %v142_v25 = vsel %vm141_vm13, %v140_v23, 0.0 }
 0x1cf   :  { %143 = vadd.xlane.f32.xlu2 %v142_v25  ;;  %v440_v27 = vmul.f32 %v439_v24, %v433_v17 }
 0x1d1   :  { %v442_v29 = vsel %vm441_vm14, %v433_v17, %v440_v27 }
 0x1d2   :  { %v445_v30 = vsel %vm443_vm15, %v444_v28, %v442_v29 }
 0x1d3   :  { %v447_v31 = vsel %vm127_vm12, %v445_v30, 0.0 }
 0x1d4   :  { %v448_v32 = vsel %vm141_vm13, %v447_v31, 0.0 }
 0x1d5   :  { %449 = vadd.xlane.f32.xlu0 %v448_v32 }
 0x242   :  { %v144_v33 = vpop.xlane.xlu2 %143 }
 0x243   :  { %v145_v34 = vrot.slane %v144_v33, 4 }
 0x245   :  { %v146_v35 = vadd.f32 %v145_v34, %v144_v33 }
 0x247   :  { %v147_v36 = vrot.slane %v146_v35, 2 }
 0x248   :  { %v450_v37 = vpop.xlane.xlu0 %449 }
 0x249   :  { %v451_v38 = vrot.slane %v450_v37, 4  ;;  %v148_v39 = vadd.f32 %v147_v36, %v146_v35 }
 0x24b   :  { %v452_v40 = vadd.f32 %v451_v38, %v450_v37  ;;  %v149_v41 = vrot.slane %v148_v39, 1 }
 0x24d   :  { %v453_v42 = vrot.slane %v452_v40, 2  ;;  %v150_v43 = vadd.f32 %v149_v41, %v148_v39 }
 0x24f   :  { %v454_v44 = vadd.f32 %v453_v42, %v452_v40  ;;  %549 = vpush %v150_v43 }
 0x251   :  { %v455_v45 = vrot.slane %v454_v44, 1 }
 0x253   :  { %v456_v46 = vadd.f32 %v455_v45, %v454_v44 }
 0x255   :  { %551 = vpush %v456_v46 }
 0x280   :  { %s550_s0 = spop %549 }
 0x281   :  { %v152_v48 = vstv %s550_s0 }
 0x282   :  { %v153_v49 = vadd.f32 %v152_v48, %v139_v47 }
 0x284   :  { %155 = vst.msk [vmem:[#allocation2] sm:$0x1] %vm100_vm0, %v153_v49 }
 0x286   :  { %s552_s21 = spop %551 }
 0x287   :  { %v458_v51 = vstv %s552_s21 }
 0x288   :  { %v459_v52 = vadd.f32 %v458_v51, %v446_v50 }
 0x28a   :  { %460 = vst.msk [vmem:[#allocation3] sm:$0x1] %vm100_vm0, %v459_v52 }
 0x28b   :  { %v466_v55 = vld [vmem:[#allocation2] sm:$0x1] }
 0x291   :  { %v464_v53 = vld [vmem:[#allocation3] sm:$0x1] }
 0x292   :  { %v465_v54 = vmul.f32 0.001, %v464_v53 }
 0x294   :  { %v467_v56 = vsub.f32 %v465_v54, %v466_v55 }
 0x296   :  { %v468_v57 = vmul.f32 0.5, %v467_v56 }
 0x298   :  { %469 = vst.msk [vmem:[#allocation7] sm:$0x1] %vm100_vm0, %v468_v57 }
 0x299   :  { %480 = dma.vmem_to_hbm [thread:$0]  %s476_s23, 16, %s478_s26, [#allocation6]  }
 0x29a   :  { %613 = dma.done.wait [#allocation6], 16  }
 0x29b   :  { %614 = vsyncadd [#allocation6], 4294967280 }
 0x29c   :  { %485 = vsyncpa [#allocation5], 1 }
 0x29d   :  { %486 = vsyncpa [#allocation6], 1 }

</bundles_post_ra>
